<compile_context>
chip_gen: v6e
topology: v6e:2x2x1
jax: 0.10.0
libtpu: 0.0.40
codegen_flags: <defaults>
</compile_context>

<pallas_src>
import functools
import math

import jax
import jax.numpy as jnp
from jax.experimental import pallas as pl
from jax.experimental.pallas import tpu as pltpu


_SUBLANE = 8        # second-to-last-dim alignment for f32 activations
_TM_CAP = 1024      # row-tile cap (sweepable 512-2048); bounds VMEM, big enough
                    # that per-step pipeline overhead is amortized
_GRID_TARGET = 8    # aim for >= this many grid steps so v7x's 2 TCs both work


def _round_up(x, m):
    return ((x + m - 1) // m) * m


def _fused_mlp_kernel(*refs, num_layers):
    """refs = (x_ref, w_0..w_{L-1}, b_0..b_{L-1}, o_ref).

    x_ref: (tm, in_dim)      -- activations (f32)
    w_i  : (in_i, out_i)     -- already transposed (x @ Wt), f32 or bf16
    b_i  : (1, out_i)
    o_ref: (tm, out_dim)
    The whole layer chain runs on-chip; accumulation is f32 regardless of the
    parameter dtype.
    """
    x_ref = refs[0]
    w_refs = refs[1:1 + num_layers]
    b_refs = refs[1 + num_layers:1 + 2 * num_layers]
    o_ref = refs[1 + 2 * num_layers]

    h = x_ref[...].astype(jnp.float32)
    for i in range(num_layers):
        w = w_refs[i][...]
        h = jnp.dot(h.astype(w.dtype), w, preferred_element_type=jnp.float32)
        h = h + b_refs[i][...].astype(jnp.float32)
        if i < num_layers - 1:
            h = jnp.maximum(h, 0.0)
    o_ref[...] = h.astype(o_ref.dtype)


def init_mlp_params(key, input_dim, hidden_dim, output_dim, num_layers):
    """PyTorch-layout params: layer i has weight (out_i, in_i), bias (out_i,)."""
    h = [hidden_dim] * (num_layers - 1)
    dims_in = [input_dim] + h
    dims_out = h + [output_dim]
    params = []
    for n, k in zip(dims_in, dims_out):
        key, wk, bk = jax.random.split(key, 3)
        bound = 1.0 / jnp.sqrt(n)  # PyTorch default Linear init range
        w = jax.random.uniform(wk, (k, n), jnp.float32, -bound, bound)
        b = jax.random.uniform(bk, (k,), jnp.float32, -bound, bound)
        params.append((w, b))
    return params


def prepare_fused_params(params, param_dtype=None):
    """One-time (outside the hot path) weight transpose (+ optional bf16 cast).

    Returns (w_ts, b_rows) with w_ts[i]: (in_i, out_i) = W_i^T and
    b_rows[i]: (1, out_i).  No padding is needed: full-array-dim blocks are
    legal and the tiny feature widths keep everything VMEM-resident.
    """
    w_ts, b_rows = [], []
    for w, b in params:
        w_t = w.T
        b_r = b.reshape(1, -1)
        if param_dtype is not None:
            w_t = w_t.astype(param_dtype)
            b_r = b_r.astype(param_dtype)
        w_ts.append(w_t)
        b_rows.append(b_r)
    return w_ts, b_rows


def mlp_forward(w_ts, b_rows, x, *, tm_cap=_TM_CAP, grid_target=_GRID_TARGET):
    """Fused-MLP forward. x: (..., input_dim) -> (..., output_dim)."""
    num_layers = len(w_ts)
    out_dim = w_ts[-1].shape[1]
    lead = x.shape[:-1]
    in_dim = x.shape[-1]
    M = int(math.prod(lead)) if lead else 1
    x2d = x.reshape(M, in_dim)

    # Row tiling: cap at tm_cap, but for moderate M pick a smaller tile so the
    # grid has ~grid_target steps (keeps both v7x TensorCores busy and gives
    # the software pipeline real depth).  The M remainder is handled by the
    # grid's masked partial block -- no wrapper-side padding or slicing.
    tm = min(tm_cap, max(_SUBLANE, _round_up(pl.cdiv(M, grid_target), _SUBLANE)))
    grid = (pl.cdiv(M, tm),)

    in_specs = [pl.BlockSpec((tm, in_dim), lambda i: (i, 0))]
    for w in w_ts:
        # Constant index map -> Pallas skips the re-DMA; weight stays resident.
        in_specs.append(pl.BlockSpec(w.shape, lambda i: (0, 0)))
    for b in b_rows:
        in_specs.append(pl.BlockSpec(b.shape, lambda i: (0, 0)))
    out_spec = pl.BlockSpec((tm, out_dim), lambda i: (i, 0))

    # Conservative VMEM budget with headroom; clamp to 48 MiB so the compiler
    # keeps scratch headroom even on v7x's 64 MiB physical VMEM.
    bpe_x = jnp.dtype(x.dtype).itemsize
    vmem = 2 * tm * (in_dim + out_dim) * bpe_x                  # dbl-buffered x/out blocks
    for w, b in zip(w_ts, b_rows):
        vmem += 2 * (w.size + b.size) * jnp.dtype(w.dtype).itemsize
    max_feat = max(max(w.shape) for w in w_ts)
    vmem += 6 * tm * max_feat * 4                               # f32 in-kernel temps
    vmem_limit = int(min(max(vmem + (4 << 20), 16 << 20), 48 << 20))

    # Cost hint so XLA can overlap neighbours around this (mem-bound) call.
    flops = 2 * M * sum(w.shape[0] * w.shape[1] for w in w_ts)
    bytes_accessed = (
        x2d.size * bpe_x
        + M * out_dim * bpe_x
        + sum((w.size + b.size) * jnp.dtype(w.dtype).itemsize
              for w, b in zip(w_ts, b_rows))
    )
    cost = pl.CostEstimate(flops=flops, transcendentals=0,
                           bytes_accessed=bytes_accessed)

    kernel = functools.partial(_fused_mlp_kernel, num_layers=num_layers)
    out2d = pl.pallas_call(
        kernel,
        out_shape=jax.ShapeDtypeStruct((M, out_dim), x.dtype),
        grid_spec=pltpu.PrefetchScalarGridSpec(
            num_scalar_prefetch=0,
            grid=grid,
            in_specs=in_specs,
            out_specs=out_spec,
        ),
        compiler_params=pltpu.CompilerParams(
            dimension_semantics=("parallel",),
            vmem_limit_bytes=vmem_limit,
        ),
        cost_estimate=cost,
    )(x2d, *w_ts, *b_rows)

    return out2d.reshape(*lead, out_dim)


def mlp_reference(params, x):
    """Plain-JAX reference matching the PyTorch forward (high-precision dots)."""
    num_layers = len(params)
    for i, (w, b) in enumerate(params):
        x = jnp.dot(x, w.T, precision=jax.lax.Precision.HIGHEST) + b
        if i < num_layers - 1:
            x = jax.nn.relu(x)
    return x


if __name__ == "__main__":
    key = jax.random.PRNGKey(0)
    input_dim, hidden_dim, output_dim, num_layers = 32, 32, 16, 3
    batch, seq = 2, 8

    pkey, xkey = jax.random.split(key)
    params = init_mlp_params(pkey, input_dim, hidden_dim, output_dim, num_layers)
    x = jax.random.normal(xkey, (batch, seq, input_dim), jnp.float32)

    ref = mlp_reference(params, x)

    # f32 params: tight correctness check.
    w_ts, b_rows = prepare_fused_params(params)
    out = jax.block_until_ready(mlp_forward(w_ts, b_rows, x))
    assert out.shape == (batch, seq, output_dim), out.shape
    assert jnp.allclose(out, ref, atol=1e-4, rtol=1e-4), "f32 mismatch vs reference"

    # bf16 params (bandwidth-optimized path recommended for v6e/v7x):
    # same kernel, f32 accumulation, looser tolerance from bf16 rounding.
    w_bf, b_bf = prepare_fused_params(params, param_dtype=jnp.bfloat16)
    out_bf = jax.block_until_ready(mlp_forward(w_bf, b_bf, x))
    assert out_bf.shape == (batch, seq, output_dim), out_bf.shape
    assert jnp.allclose(out_bf, ref, atol=6e-2, rtol=6e-2), "bf16 mismatch vs reference"

    print("KERNEL_OK")
</pallas_src>

<mosaic_0001>
module attributes {stable_mosaic.version = 11 : i64} {
  func.func @_fused_mlp_kernel(%arg0: i32, %arg1: memref<8x32xf32, #tpu.memory_space<vmem>>, %arg2: memref<32x32xf32, #tpu.memory_space<vmem>>, %arg3: memref<32x32xf32, #tpu.memory_space<vmem>>, %arg4: memref<32x16xf32, #tpu.memory_space<vmem>>, %arg5: memref<1x32xf32, #tpu.memory_space<vmem>>, %arg6: memref<1x32xf32, #tpu.memory_space<vmem>>, %arg7: memref<1x16xf32, #tpu.memory_space<vmem>>, %arg8: memref<8x16xf32, #tpu.memory_space<vmem>>) attributes {dimension_semantics = [#tpu.dimension_semantics<parallel>], iteration_bounds = array<i64: 2>, scalar_prefetch = 0 : i64, scratch_operands = 0 : i64, tpu.core_type = #tpu.core_type<tc>, window_params = [{transform_indices = @transform_0, window_bounds = array<i64: 8, 32>}, {pipeline_mode = #tpu.pipeline_mode<synchronous>, transform_indices = @transform_1, window_bounds = array<i64: 32, 32>}, {pipeline_mode = #tpu.pipeline_mode<synchronous>, transform_indices = @transform_2, window_bounds = array<i64: 32, 32>}, {pipeline_mode = #tpu.pipeline_mode<synchronous>, transform_indices = @transform_3, window_bounds = array<i64: 32, 16>}, {pipeline_mode = #tpu.pipeline_mode<synchronous>, transform_indices = @transform_4, window_bounds = array<i64: 1, 32>}, {pipeline_mode = #tpu.pipeline_mode<synchronous>, transform_indices = @transform_5, window_bounds = array<i64: 1, 32>}, {pipeline_mode = #tpu.pipeline_mode<synchronous>, transform_indices = @transform_6, window_bounds = array<i64: 1, 16>}, {transform_indices = @transform_7, window_bounds = array<i64: 8, 16>}]} {
    %c0 = arith.constant 0 : index
    %c0_0 = arith.constant 0 : index
    %0 = vector.load %arg1[%c0, %c0_0] : memref<8x32xf32, #tpu.memory_space<vmem>>, vector<8x32xf32>
    %c0_1 = arith.constant 0 : index
    %c0_2 = arith.constant 0 : index
    %1 = vector.load %arg2[%c0_1, %c0_2] : memref<32x32xf32, #tpu.memory_space<vmem>>, vector<32x32xf32>
    %cst = arith.constant dense<0.000000e+00> : vector<8x32xf32>
    %2 = tpu.matmul %0, %1, %cst {dimension_numbers = #tpu.dot_dimension_numbers<[1], [0], [0], [1], [0, 0, 1, 1], [], []>} : vector<8x32xf32>, vector<32x32xf32>, vector<8x32xf32> -> vector<8x32xf32>
    %c0_3 = arith.constant 0 : index
    %c0_4 = arith.constant 0 : index
    %3 = vector.load %arg5[%c0_3, %c0_4] : memref<1x32xf32, #tpu.memory_space<vmem>>, vector<1x32xf32>
    %4 = vector.broadcast %3 : vector<1x32xf32> to vector<8x32xf32>
    %5 = arith.addf %2, %4 : vector<8x32xf32>
    %cst_5 = arith.constant 0.000000e+00 : f32
    %6 = vector.broadcast %cst_5 : f32 to vector<8x32xf32>
    %7 = arith.maximumf %5, %6 : vector<8x32xf32>
    %c0_6 = arith.constant 0 : index
    %c0_7 = arith.constant 0 : index
    %8 = vector.load %arg3[%c0_6, %c0_7] : memref<32x32xf32, #tpu.memory_space<vmem>>, vector<32x32xf32>
    %cst_8 = arith.constant dense<0.000000e+00> : vector<8x32xf32>
    %9 = tpu.matmul %7, %8, %cst_8 {dimension_numbers = #tpu.dot_dimension_numbers<[1], [0], [0], [1], [0, 0, 1, 1], [], []>} : vector<8x32xf32>, vector<32x32xf32>, vector<8x32xf32> -> vector<8x32xf32>
    %c0_9 = arith.constant 0 : index
    %c0_10 = arith.constant 0 : index
    %10 = vector.load %arg6[%c0_9, %c0_10] : memref<1x32xf32, #tpu.memory_space<vmem>>, vector<1x32xf32>
    %11 = vector.broadcast %10 : vector<1x32xf32> to vector<8x32xf32>
    %12 = arith.addf %9, %11 : vector<8x32xf32>
    %cst_11 = arith.constant 0.000000e+00 : f32
    %13 = vector.broadcast %cst_11 : f32 to vector<8x32xf32>
    %14 = arith.maximumf %12, %13 : vector<8x32xf32>
    %c0_12 = arith.constant 0 : index
    %c0_13 = arith.constant 0 : index
    %15 = vector.load %arg4[%c0_12, %c0_13] : memref<32x16xf32, #tpu.memory_space<vmem>>, vector<32x16xf32>
    %cst_14 = arith.constant dense<0.000000e+00> : vector<8x16xf32>
    %16 = tpu.matmul %14, %15, %cst_14 {dimension_numbers = #tpu.dot_dimension_numbers<[1], [0], [0], [1], [0, 0, 1, 1], [], []>} : vector<8x32xf32>, vector<32x16xf32>, vector<8x16xf32> -> vector<8x16xf32>
    %c0_15 = arith.constant 0 : index
    %c0_16 = arith.constant 0 : index
    %17 = vector.load %arg7[%c0_15, %c0_16] : memref<1x16xf32, #tpu.memory_space<vmem>>, vector<1x16xf32>
    %18 = vector.broadcast %17 : vector<1x16xf32> to vector<8x16xf32>
    %19 = arith.addf %16, %18 : vector<8x16xf32>
    %c0_17 = arith.constant 0 : index
    %c0_18 = arith.constant 0 : index
    %20 = vector.load %arg8[%c0_17, %c0_18] : memref<8x16xf32, #tpu.memory_space<vmem>>, vector<8x16xf32>
    tpu.vector_store %arg8[%c0_17, %c0_18], %19 {strides = array<i32>} : memref<8x16xf32, #tpu.memory_space<vmem>>, vector<8x16xf32>,
    return
  }
  func.func @transform_0(%arg0: i32) -> (i32, i32) {
    %c0_i32 = arith.constant 0 : i32
    %c0_i32_0 = arith.constant 0 : i32
    return %arg0, %c0_i32 : i32, i32
  }
  func.func @transform_1(%arg0: i32) -> (i32, i32) {
    %c0_i32 = arith.constant 0 : i32
    %c0_i32_0 = arith.constant 0 : i32
    %c0_i32_1 = arith.constant 0 : i32
    return %c0_i32, %c0_i32_0 : i32, i32
  }
  func.func @transform_2(%arg0: i32) -> (i32, i32) {
    %c0_i32 = arith.constant 0 : i32
    %c0_i32_0 = arith.constant 0 : i32
    %c0_i32_1 = arith.constant 0 : i32
    return %c0_i32, %c0_i32_0 : i32, i32
  }
  func.func @transform_3(%arg0: i32) -> (i32, i32) {
    %c0_i32 = arith.constant 0 : i32
    %c0_i32_0 = arith.constant 0 : i32
    %c0_i32_1 = arith.constant 0 : i32
    return %c0_i32, %c0_i32_0 : i32, i32
  }
  func.func @transform_4(%arg0: i32) -> (i32, i32) {
    %c0_i32 = arith.constant 0 : i32
    %c0_i32_0 = arith.constant 0 : i32
    %c0_i32_1 = arith.constant 0 : i32
    return %c0_i32, %c0_i32_0 : i32, i32
  }
  func.func @transform_5(%arg0: i32) -> (i32, i32) {
    %c0_i32 = arith.constant 0 : i32
    %c0_i32_0 = arith.constant 0 : i32
    %c0_i32_1 = arith.constant 0 : i32
    return %c0_i32, %c0_i32_0 : i32, i32
  }
  func.func @transform_6(%arg0: i32) -> (i32, i32) {
    %c0_i32 = arith.constant 0 : i32
    %c0_i32_0 = arith.constant 0 : i32
    %c0_i32_1 = arith.constant 0 : i32
    return %c0_i32, %c0_i32_0 : i32, i32
  }
  func.func @transform_7(%arg0: i32) -> (i32, i32) {
    %c0_i32 = arith.constant 0 : i32
    %c0_i32_0 = arith.constant 0 : i32
    return %arg0, %c0_i32 : i32, i32
  }
}

</mosaic_0001>

<bundles_post_ra>
// kernel: tpu_custom_call.1
= control target key start
LH: loop header
LB: loop body
LE: loop exit
PB: predicated region body
PF: predicated region fallthrough
CT: control target
= control target key end

     0   :  { %12 = vsyncpa [#allocation3], 0  ;;  %s1040_s0 = inlined_call_operand.vmem [shape: f32[16,32], index: 0, kind: input, shape index: {}]   ;;  %s1041_s1 = inlined_call_operand.vmem [shape: f32[32,32], index: 1, kind: input, shape index: {}]   ;;  %s1042_s2 = inlined_call_operand.hbm [shape: f32[32,32], index: 2, kind: input, shape index: {}]   ;;  %s1043_s3 = inlined_call_operand.vmem [shape: f32[32,16], index: 3, kind: input, shape index: {}]   ;;  %s1044_s4 = inlined_call_operand.vmem [shape: f32[1,32], index: 4, kind: input, shape index: {}]   ;;  %s1045_s5 = inlined_call_operand.vmem [shape: f32[1,32], index: 5, kind: input, shape index: {}]   ;;  %s1046_s6 = inlined_call_operand.vmem [shape: f32[1,16], index: 6, kind: input, shape index: {}]   ;;  %s1047_s7 = inlined_call_operand.hbm [shape: f32[16,16], index: 7, kind: output, shape index: {}]  }
   0x1   :  { %13 = vsyncpa [#allocation4], 0 }
   0x2   :  { %15 = vsyncpa [#allocation4 + $0x1], 0  ;;  %s890_s24 = smov 0   ;;  %s892_s25 = smov 0  }
   0x3   :  { %s894_s26 = smov 0   ;;  %s896_s27 = smov 0  }
   0x4 LB: > { %s911_s28 = sadd.s32 4294967295, %s842_s27   ;;  %s632_s29 = sadd.s32 4294967294, %s842_s27   ;;  %s842_s27 = sphi %s896_s27, %s1055_s27   ;;  %s838_s26 = sphi %s894_s26, %s1054_s26   ;;  %s834_s25 = sphi %s892_s25, %s1053_s25   ;;  %s830_s24 = sphi %s890_s24, %s1052_s24  }
   0x5   : > { %s915_s30 = sadd.s32 1, %s842_s27   ;;  %s180_s8 = sadd.s32 1, %s838_s26 }
   0x6   : > { %s177_s9 = ssub.s32 %s842_s27, %s915_s30  ;;  %p190_p0 = scmp.ne.s32.totalorder %s838_s26, %s834_s25 }
   0x7   : > { %p178_p1 = scmp.eq.s32.totalorder %s177_s9, 0  ;;  %p191_p2 = scmp.eq.s32.totalorder %s911_s28, 1 }
   0x8   : > { %p196_p3 = scmp.ne.s32.totalorder %s834_s25, %s830_s24  ;;  %p197_p4 = scmp.eq.s32.totalorder %s632_s29, 1 }
   0x9   : > { %s926_s10 = scalar_select %p178_p1, %s838_s26, %s180_s8  }
   0xa   : > { %p928_p5 = por %p191_p2, %p190_p0  ;;  %p932_p6 = por %p197_p4, %p196_p3 }
   0xb   : > { %p633_p7 = scmp.ge.s32.totalorder %s842_s27, 1  ;;  %p204_p8 = scmp.lt.s32.totalorder %s842_s27, 3 }
   0xc   : > { %s1049_s12 = scalar_select %p932_p6, 1, 0 }
   0xd   : > { %p712_p9 = scmp.eq.s32.totalorder %s911_s28, 0  ;;  %p939_p10 = pnand %p633_p7, %p204_p8 }
   0xe   : > { %s844_s14 = smov [#allocation2]  }
   0xf   : > { %s219_s15 = sshll.u32 %s844_s14, 4  ;;  %p704_p11 = pneg %p939_p10  ;;  %s220_s15 = int_to_ptr.vmem [resolvable:$true] %s219_s15 }
  0x10   : > { %s763_s16 = scalar_lea.vmem %s220_s15, 512  ;;  %p771_p3 = scmp.lt.s32.totalorder %s220_s15, %s220_s15 }
  0x11   : > { %p705_p12 = pnand %p712_p9, %p704_p11  ;;  %p764_p0 = scmp.ne.s32.totalorder %s220_s15, %s763_s16 }
  0x12   : > { %p772_p4 = scmp.lt.s32.totalorder %s763_s16, %s763_s16 }
  0x13   : > { %p754_p13 = pneg %p705_p12 }
  0x14   : > { %p773_p6 = por %p772_p4, %p771_p3 }
  0x15   : > { %p766_p1 = pnand %p764_p0, %p754_p13 }
  0x17   : > { %p767_p2 = pneg %p766_p1 }
  0x19   : > { %p774_p7 = pnand %p773_p6, %p767_p2 }
  0x1b   : > { %777 = shalt.err (!%p774_p7)
}
  0x1c   : > { %s845_s17 = smov 128   ;;  %s846_s18 = smov 8  }
  0x1d   : > { %707 = dma.hbm_to_vmem [thread:$0]  (!%p705_p12), %s1042_s2, 512, %s220_s15, [#allocation3], %s845_s17, %s845_s17, %s846_s18  }
  0x1e   : > { %254 = sbr.rel (%p939_p10) target bundleno = 648 (0x288), region = 48 }
  0x23   : > { %821 = dma.done.wait (%p712_p9), [#allocation3], 512  }
  0x24   : > { %823 = vsyncadd (%p712_p9), [#allocation3], 4294966784  ;;  %p285_p8 = scmp.lt.s32.totalorder %s911_s28, 1  ;;  %v847_v0 = vmov 0.0   ;;  %vm848_vm0 = vmmov 0   ;;  %v293_v1 = vld [vmem:[%s1041_s1 + $0x18] sm:$0xff] }
  0x25   : > { %665 = vmatprep.subr.mxu0 %v847_v0  ;;  %673 = vmatprep.mubr.msk.f32.mxu0 %vm848_vm0, %v847_v0  ;;  %v292_v2 = vld [vmem:[%s1041_s1 + $0x10] sm:$0xff]  ;;  %v379_v3 = vld [vmem:[#allocation2 + $0x18] sm:$0xff]  ;;  %v291_v4 = vld [vmem:[%s1041_s1 + $0x8] sm:$0xff]  ;;  %vm301_vm1 = vcmask 261120   ;;  %s282_s18 = sand.u32 1, %s834_s25   ;;  %vm545_vm2 = vcmask 130048  }
  0x26   : > { %s286_s21 = scalar_select %p285_p8, %s911_s28, 1  ;;  %676 = vmatprep.subr.mxu1 %v847_v0  ;;  %684 = vmatprep.mubr.msk.f32.mxu1 %vm848_vm0, %v847_v0  ;;  %v290_v5 = vld [vmem:[%s1041_s1] sm:$0xff]  ;;  %v378_v7 = vld [vmem:[#allocation2 + $0x10] sm:$0xff]  ;;  %v377_v8 = vld [vmem:[#allocation2 + $0x8] sm:$0xff] }
  0x27   : > { %666 = vmatpush3.msra.mxu0 %v293_v1  ;;  %677 = vmatpush3.msra.mxu1 %v379_v3  ;;  %v376_v9 = vld [vmem:[#allocation2] sm:$0xff]  ;;  %v464_v10 = vld [vmem:[%s1043_s3 + $0x18] sm:$0xff]  ;;  %v463_v16 = vld [vmem:[%s1043_s3 + $0x10] sm:$0xff]  ;;  %s638_s19 = sshll.u32 %s282_s18, 3  ;;  %s548_s14 = scalar_lea.sflag [#allocation4], %s282_s18 }
  0x28   : > { %s639_s22 = sshll.u32 %s286_s21, 3  ;;  %667 = vmatprep.subr.mxu0 %v847_v0  ;;  %678 = vmatprep.subr.mxu1 %v847_v0  ;;  %v640_v11 = vld [vmem:[%s1044_s4] ss:$0 sm:$0xff]  ;;  %v462_v17 = vld [vmem:[%s1043_s3 + $0x8] sm:$0xff]  ;;  %s284_s23 = scalar_lea.vmem [#allocation5], %s638_s19 }
  0x29   : > { %s288_s17 = scalar_lea.vmem %s1040_s0, %s639_s22  ;;  %668 = vmatpush3.msra.mxu0 %v292_v2  ;;  %679 = vmatpush3.msra.mxu1 %v378_v7  ;;  %v461_v18 = vld [vmem:[%s1043_s3] sm:$0xff]  ;;  %s647_s22 = sshll.u32 %s911_s28, 7 }
  0x2a   : > { %669 = vmatprep.subr.mxu0 %v847_v0  ;;  %v289_v6 = vld [vmem:[%s288_s17] sm:$0xff]  ;;  %680 = vmatprep.subr.mxu1 %v847_v0  ;;  %s561_s29 = sshll.u32 %s284_s23, 4  ;;  %s1005_s13 = scalar_lea.hbm %s1047_s7, %s647_s22  ;;  %s562_s29 = int_to_ptr.vmem [resolvable:$true] %s561_s29 }
  0x2b   : > { %670 = vmatpush3.msra.mxu0 %v291_v4  ;;  %681 = vmatpush3.msra.mxu1 %v377_v8  ;;  %v642_v19 = vld [vmem:[%s1045_s5] ss:$0 sm:$0xff]  ;;  %s778_s15 = scalar_lea.vmem %s562_s29, 128  ;;  %s849_s28 = smov [#allocation5]  }
  0x2c   : > { %671 = vmatprep.subr.mxu0 %v847_v0  ;;  %682 = vmatprep.subr.mxu1 %v847_v0  ;;  %v644_v24 = vld [vmem:[%s1046_s6] ss:$0 sm:$0xff]  ;;  %p779_p6 = scmp.ne.s32.totalorder %s562_s29, %s778_s15  ;;  %s782_s16 = sshll.u32 %s849_s28, 4  ;;  %s783_s16 = int_to_ptr.vmem [resolvable:$false] %s782_s16 }
  0x2d   : > { %672 = vmatpush3.msra.mxu0 %v290_v5  ;;  %683 = vmatpush3.msra.mxu1 %v376_v9  ;;  %s784_s17 = scalar_lea.vmem %s783_s16, 256  ;;  %p785_p11 = scmp.lt.s32.totalorder %s562_s29, %s783_s16 }
  0x2e   : > { %674 = vmatmul.mubr.msk.f32.vlgmr.msra.gmra.mxu0 %vm301_vm1, %v289_v6  ;;  %687 = vmatprep.subr.mxu0 %v847_v0  ;;  %p780_p9 = pnand %p779_p6, %p928_p5  ;;  %p786_p12 = scmp.lt.s32.totalorder %s784_s17, %s778_s15 }
  0x2f   : > { %695 = vmatprep.mubr.msk.f32.mxu0 %vm848_vm0, %v847_v0  ;;  %688 = vmatpush3.msra.mxu0 %v464_v10 }
  0x30   : > { %689 = vmatprep.subr.mxu0 %v847_v0  ;;  %p781_p10 = pneg %p780_p9  ;;  %p787_p13 = por %p786_p12, %p785_p11 }
  0x31   : > { %690 = vmatpush3.msra.mxu0 %v463_v16 }
  0x32   : > { %691 = vmatprep.subr.mxu0 %v847_v0  ;;  %p788_p0 = pnand %p787_p13, %p781_p10 }
  0x33   : > { %692 = vmatpush3.msra.mxu0 %v462_v17 }
  0x34   : > { %693 = vmatprep.subr.mxu0 %v847_v0 }
  0x35   : > { %694 = vmatpush3.msra.mxu0 %v461_v18 }
  0xee   : > { %v371_v12 = vpop.f32.mrf.mxu0 }
  0xef   : > { %v372_v13 = vadd.f32 %v640_v11, %v371_v12 }
  0xf0   : > { %v675_v14 = vpop.f32.mrf.mxu0 }
  0xf1   : > { %v375_v15 = vmax.f32 %v372_v13, 0.0 }
  0xf3   : > { %685 = vmatmul.mubr.msk.f32.vlgmr.msra.gmra.mxu1 %vm301_vm1, %v375_v15 }
 0x1b3   : > { %v456_v20 = vpop.f32.mrf.mxu1 }
 0x1b4   : > { %v457_v21 = vadd.f32 %v642_v19, %v456_v20 }
 0x1b5   : > { %v686_v22 = vpop.f32.mrf.mxu1 }
 0x1b6   : > { %v460_v23 = vmax.f32 %v457_v21, 0.0 }
 0x1b8   : > { %696 = vmatmul.mubr.msk.f32.vlgmr.msra.gmra.mxu0 %vm301_vm1, %v460_v23 }
 0x278   : > { %v541_v25 = vpop.f32.mrf.mxu0 }
 0x279   : > { %v542_v26 = vadd.f32 %v644_v24, %v541_v25 }
 0x27a   : > { %v697_v27 = vpop.f32.mrf.mxu0 }
 0x27b   : > { %546 = vst.msk [vmem:[%s284_s23] sm:$0xff] %vm545_vm2, %v542_v26 }
 0x27c   : > { %791 = shalt.err (!%p788_p0)
}
 0x27d   : > { %s792_s19 = scalar_lea.hbm %s1005_s13, 128  ;;  %s796_s21 = scalar_lea.hbm %s1047_s7, 256 }
 0x27e   : > { %p793_p1 = scmp.ne.s32.totalorder %s1005_s13, %s792_s19  ;;  %p797_p4 = scmp.lt.s32.totalorder %s1005_s13, %s1047_s7 }
 0x27f   : > { %p798_p7 = scmp.lt.s32.totalorder %s796_s21, %s792_s19 }
 0x280   : > { %p794_p2 = pnand %p793_p1, %p928_p5 }
 0x281   : > { %p799_p8 = por %p798_p7, %p797_p4 }
 0x282   : > { %p795_p3 = pneg %p794_p2 }
 0x284   : > { %p800_p6 = pnand %p799_p8, %p795_p3 }
 0x286   : > { %803 = shalt.err (!%p800_p6)
}
 0x287   : > { %702 = dma.vmem_to_hbm [thread:$0]  (%p928_p5), %s562_s29, 128, %s1005_s13, %s548_s14  }
 0x288 PF: > { %p714_p9 = scmp.ge.s32.totalorder %s842_s27, 2  ;;  %s573_s8 = sand.u32 1, %s830_s24  }
 0x289   : > { %p1051_p10 = scmp.ne.s32.totalorder %s1049_s12, 0  ;;  %s574_s9 = scalar_lea.sflag [#allocation4], %s573_s8 }
 0x28b   : > { %p709_p11 = pnand %p714_p9, %p1051_p10 }
 0x28d   : > { %p710_p12 = pneg %p709_p11 }
 0x28f   : > { %825 = dma.done.wait (%p710_p12), %s574_s9, 128  }
 0x290   : > { %827 = vsyncadd (%p710_p12), %s574_s9, 4294967168  ;;  %p18_p13 = scmp.ge.s32.totalorder %s915_s30, 4   ;;  %s1052_s24 = smov %s834_s25 }
 0x291   : > { %s1053_s25 = smov %s838_s26  ;;  %s1054_s26 = smov %s926_s10 }
 0x292   : > { %s1055_s27 = smov %s915_s30  ;;  %20 = sbr.rel (!%p18_p13) target bundleno = 4 (0x4), region = 88 }
 0x297   :  { %579 = vsyncpa [#allocation3], 1 }
 0x298   :  { %581 = vsyncpa [#allocation3 + $0x1], 1 }
 0x299   :  { %582 = vsyncpa [#allocation4], 1 }
 0x29a   :  { %584 = vsyncpa [#allocation4 + $0x1], 1 }

</bundles_post_ra>
